<compile_context>
chip_gen: v5e
topology: v5e:2x2
jax: 0.10.0
libtpu: 0.0.40
codegen_flags: <defaults>
</compile_context>

<pallas_src>
import functools
import math

import jax
import jax.numpy as jnp
from jax import lax
from jax.experimental import pallas as pl
from jax.experimental.pallas import tpu as pltpu


# ---------------------------------------------------------------------------
# Helpers
# ---------------------------------------------------------------------------
def _round_up(x, m):
    return (x + m - 1) // m * m


def _pad2(a, rows, cols, value=0.0):
    pr, pc = rows - a.shape[0], cols - a.shape[1]
    if pr == 0 and pc == 0:
        return a
    return jnp.pad(a, ((0, pr), (0, pc)), constant_values=value)


def _vmem_capacity_bytes():
    # Generation-aware VMEM capacity (v7x: 64 MiB/TC, v5e/v6e: 128 MiB).
    try:
        cap = getattr(pltpu.get_tpu_info(), "vmem_capacity_bytes", None)
        if cap:
            return int(cap)
    except Exception:
        pass
    return 64 * 1024 * 1024      # conservative fallback (safe on every gen)


def _pick_row_block(b_p, hid_p, vmem_limit):
    # Bound the contrastive row block so ~8 live (row_block, b_p) 32-bit
    # temporaries (logits, masked exp, masked logits, iota, masks, ...) plus
    # the resident bf16 o1/o2 fit comfortably inside the VMEM limit.
    resident = 2 * b_p * hid_p * 2 + 4 * b_p * 4
    budget = int(vmem_limit * 0.75) - resident
    rb = 8
    while (rb * 2 <= 512 and b_p % (rb * 2) == 0
           and 8 * (rb * 2) * b_p * 4 <= budget):
        rb *= 2
    return rb


def _pick_k_block(in_p, b_p, hid_p, vmem_limit):
    # K block of Linear1: double-buffered x/xs/w1 tiles + resident f32
    # accumulators, bf16 outputs and the (small) Linear2 weights.
    resident = (2 * b_p * hid_p * 4 + 2 * 2 * b_p * hid_p * 2
                + hid_p * hid_p * 2 + 8 * hid_p * 4)
    budget = int(vmem_limit * 0.75) - resident
    tk = 128
    while (tk * 2 <= min(in_p, 2048) and in_p % (tk * 2) == 0
           and (2 * 2 * b_p * (tk * 2) * 2 + 2 * (tk * 2) * hid_p * 2) <= budget):
        tk *= 2
    return tk


# ---------------------------------------------------------------------------
# Kernel 1: projector (both views) + reg loss
# ---------------------------------------------------------------------------
def _projector_kernel(x_ref, xs_ref, w1_ref, pro_ref, b1_ref, gamma_ref,
                      beta_ref, w2_ref, b2_ref,
                      o1_ref, o2_ref, reg_ref,
                      h1_acc, h2_acc,
                      *, batch, inv_sqrt_t, weight_decay):
    k = pl.program_id(0)

    @pl.when(k == 0)
    def _():
        h1_acc[...] = jnp.zeros_like(h1_acc)
        h2_acc[...] = jnp.zeros_like(h2_acc)

    # Linear1, K-tiled (bf16 MXU inputs, f32 accumulation). w1 block shared
    # by both views.
    w1 = w1_ref[...]
    h1_acc[...] += jnp.dot(x_ref[...], w1, preferred_element_type=jnp.float32)
    h2_acc[...] += jnp.dot(xs_ref[...], w1, preferred_element_type=jnp.float32)

    @pl.when(k == pl.num_programs(0) - 1)
    def _():
        b_p = o1_ref.shape[0]
        inv_b = jnp.float32(1.0 / batch)
        # Padded batch rows must not pollute the BatchNorm batch statistics.
        row_valid = lax.broadcasted_iota(jnp.int32, (b_p, 1), 0) < batch

        b1 = b1_ref[...]
        gamma = gamma_ref[...]
        beta = beta_ref[...]
        w2 = w2_ref[...]
        b2 = b2_ref[...]

        def finish(h_acc, o_ref):
            h = h_acc[...] + b1
            hm = jnp.where(row_valid, h, 0.0)
            mean = jnp.sum(hm, axis=0, keepdims=True) * inv_b
            c = h - mean
            cm = jnp.where(row_valid, c, 0.0)
            var = jnp.sum(cm * cm, axis=0, keepdims=True) * inv_b
            # BatchNorm1d (training mode, biased variance), ReLU.
            h = jnp.maximum(c * (lax.rsqrt(var + 1e-5) * gamma) + beta, 0.0)
            out = jnp.dot(h.astype(jnp.bfloat16), w2,
                          preferred_element_type=jnp.float32) + b2
            # F.normalize(dim=1, eps=1e-12) with 1/sqrt(t) folded in so the
            # downstream Gram matrix equals  out_n @ out_n.T / t  directly.
            ss = jnp.sum(out * out, axis=1, keepdims=True)
            scale = lax.rsqrt(jnp.maximum(ss, 1e-24)) * inv_sqrt_t
            o_ref[...] = (out * scale).astype(o_ref.dtype)

        finish(h1_acc, o1_ref)
        finish(h2_acc, o2_ref)

        # reg_loss = weight_decay * ||F.normalize(pro, dim=1)||_F^2
        p = pro_ref[...].astype(jnp.float32)
        pss = jnp.sum(p * p, axis=1, keepdims=True)
        reg = weight_decay * jnp.sum(pss / jnp.maximum(pss, 1e-24))
        reg_ref[...] = jnp.broadcast_to(reg, (1, 128))


# ---------------------------------------------------------------------------
# Kernel 2: supervised-contrastive graph loss (both views), blocked over rows
# ---------------------------------------------------------------------------
def _contrastive_kernel(o1_ref, o2_ref, lab_row_ref, lab_col_ref, part_ref,
                        *, batch, row_block):
    b_p = o1_ref.shape[0]
    r0 = pl.multiple_of(pl.program_id(0) * row_block, row_block)

    # Boolean masks, built once per block and shared by both views
    # (share=True => mask1 == mask2). Single full-tile iota for the columns.
    col_ids = lax.broadcasted_iota(jnp.int32, (row_block, b_p), 1)
    row_ids = r0 + lax.broadcasted_iota(jnp.int32, (row_block, 1), 0)
    off_valid = (col_ids != row_ids) & (col_ids < batch)     # off-diag & real col
    row_valid = row_ids < batch

    lab_r = lab_col_ref[...]                                  # (row_block, 1)
    pos = (lab_r == lab_row_ref[...]) & off_valid             # (row_block, b_p)
    pos_cnt = jnp.sum(jnp.where(pos, 1.0, 0.0), axis=1, keepdims=True)
    # NOTE: rows whose label is unique in the batch give 0/0 -> NaN, matching
    # the PyTorch reference behaviour.
    inv_cnt = 1.0 / pos_cnt

    def one_view(o_ref):
        o_blk = o_ref[pl.ds(r0, row_block), :]
        # trans-B contraction feeds the MXU directly (no transpose); the
        # 1/temperature scale is already folded into o (1/sqrt(t) per operand).
        logits = lax.dot_general(
            o_blk, o_ref[...],
            dimension_numbers=(((1,), (1,)), ((), ())),
            preferred_element_type=jnp.float32)
        # Row-max subtraction: mathematically identical, overflow-safe.
        row_max = jnp.max(logits, axis=1, keepdims=True)
        exp_l = jnp.where(off_valid, jnp.exp(logits - row_max), 0.0)
        log_denom = jnp.log(jnp.sum(exp_l, axis=1, keepdims=True)) + row_max
        # sum_j pos*(logits - log_denom) == sum(where(pos,logits,0)) - cnt*log_denom
        s = (jnp.sum(jnp.where(pos, logits, 0.0), axis=1, keepdims=True)
             - pos_cnt * log_denom)
        return jnp.sum(jnp.where(row_valid, -s * inv_cnt, 0.0))

    part = one_view(o1_ref) + one_view(o2_ref)
    part_ref[...] = jnp.broadcast_to(part, (1, 128))


# ---------------------------------------------------------------------------
# WCL forward (share=True)
# ---------------------------------------------------------------------------
@functools.partial(jax.jit, static_argnums=(5,))
def wcl_forward(params, doc_fea, doc_fea_svd, pro, labels, temperature):
    # share=True path only.
    # TODO(synk): the share=False branch uses scipy csr_matrix +
    #             connected_components (host-side graph algorithm) and
    #             undefined `even`/`odd` indices; not implemented.
    b, in_fea = doc_fea.shape
    hid = params["w2"].shape[1]

    in_p = _round_up(in_fea, 128)
    hid_p = _round_up(hid, 128)
    pro_p = _round_up(pro.shape[1], 128)
    # Pad the batch (lane-dense contrastive tiles for big B, sublane-aligned
    # for small B); padded rows/cols are masked inside the kernels.
    b_p = _round_up(b, 128) if b > 128 else _round_up(b, 8)

    vmem_cap = _vmem_capacity_bytes()
    vmem_limit = max(32 * 1024 * 1024, vmem_cap - 16 * 1024 * 1024)
    tk = _pick_k_block(in_p, b_p, hid_p, vmem_limit)
    row_block = _pick_row_block(b_p, hid_p, vmem_limit)
    n_blocks = b_p // row_block

    # bf16 staging of the large operands halves DMA bytes / VMEM residency;
    # BN / softmax math stays f32 inside the kernels. Zero-padding of feature
    # dims is exact for Linear/BN/ReLU/L2-normalize.
    x = _pad2(doc_fea, b_p, in_p).astype(jnp.bfloat16)
    xs = _pad2(doc_fea_svd, b_p, in_p).astype(jnp.bfloat16)
    pro_p_arr = _pad2(pro, b_p, pro_p).astype(jnp.bfloat16)
    w1 = _pad2(params["w1"], in_p, hid_p).astype(jnp.bfloat16)
    w2 = _pad2(params["w2"], hid_p, hid_p).astype(jnp.bfloat16)
    b1 = _pad2(params["b1"].astype(jnp.float32), 1, hid_p)
    gamma = _pad2(params["gamma"].astype(jnp.float32), 1, hid_p, value=1.0)
    beta = _pad2(params["beta"].astype(jnp.float32), 1, hid_p)
    b2 = _pad2(params["b2"].astype(jnp.float32), 1, hid_p)

    lab = labels.astype(jnp.int32)
    if b_p > b:
        lab = jnp.pad(lab, (0, b_p - b), constant_values=-1)  # value irrelevant (masked)
    lab_row = lab.reshape(1, b_p)   # lane-major labels (mask columns)
    lab_col = lab.reshape(b_p, 1)   # sublane-major labels (mask rows)

    vmem = pl.BlockSpec(memory_space=pltpu.MemorySpace.VMEM)

    # ---- Kernel 1: projector (both views) + reg loss -----------------------
    proj_kernel = functools.partial(
        _projector_kernel,
        batch=b,
        inv_sqrt_t=float(1.0 / math.sqrt(temperature)),
        weight_decay=0.005)

    o1, o2, reg = pl.pallas_call(
        proj_kernel,
        out_shape=(
            jax.ShapeDtypeStruct((b_p, hid_p), jnp.bfloat16),
            jax.ShapeDtypeStruct((b_p, hid_p), jnp.bfloat16),
            jax.ShapeDtypeStruct((1, 128), jnp.float32),
        ),
        grid_spec=pltpu.PrefetchScalarGridSpec(
            num_scalar_prefetch=0,
            grid=(in_p // tk,),
            in_specs=[
                pl.BlockSpec((b_p, tk), lambda k: (0, k)),      # doc_fea tile
                pl.BlockSpec((b_p, tk), lambda k: (0, k)),      # doc_fea_svd tile
                pl.BlockSpec((tk, hid_p), lambda k: (k, 0)),    # w1 tile
                vmem,                                           # pro
                vmem, vmem, vmem,                               # b1, gamma, beta
                vmem, vmem,                                     # w2, b2
            ],
            out_specs=(
                pl.BlockSpec((b_p, hid_p), lambda k: (0, 0)),   # o1
                pl.BlockSpec((b_p, hid_p), lambda k: (0, 0)),   # o2
                pl.BlockSpec((1, 128), lambda k: (0, 0)),       # reg (lane-dense)
            ),
            scratch_shapes=[
                pltpu.VMEM((b_p, hid_p), jnp.float32),          # Linear1 acc (view 1)
                pltpu.VMEM((b_p, hid_p), jnp.float32),          # Linear1 acc (view 2)
            ],
        ),
        compiler_params=pltpu.CompilerParams(
            dimension_semantics=("arbitrary",),
            vmem_limit_bytes=vmem_limit),
    )(x, xs, w1, pro_p_arr, b1, gamma, beta, w2, b2)

    # ---- Kernel 2: contrastive graph loss, row-blocked & core-parallel -----
    contra_kernel = functools.partial(
        _contrastive_kernel, batch=b, row_block=row_block)

    partials = pl.pallas_call(
        contra_kernel,
        out_shape=jax.ShapeDtypeStruct((n_blocks, 128), jnp.float32),
        grid_spec=pltpu.PrefetchScalarGridSpec(
            num_scalar_prefetch=0,
            grid=(n_blocks,),
            in_specs=[
                vmem,                                            # o1 (full, resident)
                vmem,                                            # o2 (full, resident)
                vmem,                                            # labels (1, b_p)
                pl.BlockSpec((row_block, 1), lambda i: (i, 0)),  # labels row block
            ],
            out_specs=pl.BlockSpec((1, 128), lambda i: (i, 0)),
        ),
        compiler_params=pltpu.CompilerParams(
            dimension_semantics=("parallel",),
            vmem_limit_bytes=vmem_limit),
    )(o1, o2, lab_row, lab_col)

    graph_loss = jnp.sum(partials[:, 0]) / jnp.float32(2 * b)
    return graph_loss + reg[0, 0]


# ---------------------------------------------------------------------------
# Pure-JAX reference (mirrors the PyTorch module, f32) for a tolerance check
# ---------------------------------------------------------------------------
def wcl_reference(params, doc_fea, doc_fea_svd, pro, labels, temperature):
    def proj(x):
        h = x @ params["w1"] + params["b1"]
        mean = h.mean(0, keepdims=True)
        var = ((h - mean) ** 2).mean(0, keepdims=True)
        h = (h - mean) / jnp.sqrt(var + 1e-5) * params["gamma"] + params["beta"]
        h = jnp.maximum(h, 0.0)
        return h @ params["w2"] + params["b2"]

    def normalize(x):
        n = jnp.sqrt(jnp.sum(x * x, axis=1, keepdims=True))
        return x / jnp.maximum(n, 1e-12)

    o1 = normalize(proj(doc_fea))
    o2 = normalize(proj(doc_fea_svd))
    b = o1.shape[0]
    offdiag = 1.0 - jnp.eye(b)
    mask = (labels[:, None] == labels[None, :]).astype(jnp.float32) * offdiag

    def sup(o):
        logits = (o @ o.T) / temperature
        exp_l = jnp.exp(logits) * offdiag
        log_prob = logits - jnp.log(exp_l.sum(1, keepdims=True))
        mlpp = (mask * log_prob).sum(1) / mask.sum(1)
        return (-mlpp).mean()

    graph = (sup(o1) + sup(o2)) / 2.0
    reg = 0.005 * jnp.sum(normalize(pro) ** 2)
    return graph + reg


# ---------------------------------------------------------------------------
# Parameter init (weights stored as (in, out), i.e. transposed vs nn.Linear)
# ---------------------------------------------------------------------------
def init_wcl_params(key, in_fea, hid_fea):
    k1, k2, k3, k4 = jax.random.split(key, 4)

    def lin(k, fan_in, fan_out):
        bound = 1.0 / jnp.sqrt(fan_in)
        kw, kb = jax.random.split(k)
        w = jax.random.uniform(kw, (fan_in, fan_out), jnp.float32, -bound, bound)
        b = jax.random.uniform(kb, (1, fan_out), jnp.float32, -bound, bound)
        return w, b

    w1, b1 = lin(k1, in_fea, hid_fea)
    w2, b2 = lin(k2, hid_fea, hid_fea)
    gamma = jnp.ones((1, hid_fea), jnp.float32)    # BatchNorm1d default weight
    beta = jnp.zeros((1, hid_fea), jnp.float32)    # BatchNorm1d default bias
    # projector_2 params exist in the module but are unused when share=True.
    w1b, b1b = lin(k3, in_fea, hid_fea)
    w2b, b2b = lin(k4, hid_fea, hid_fea)
    return dict(w1=w1, b1=b1, gamma=gamma, beta=beta, w2=w2, b2=b2,
                w1_2=w1b, b1_2=b1b, w2_2=w2b, b2_2=b2b)


if __name__ == "__main__":
    in_fea, hid_fea, temperature = 128, 128, 0.5   # lane-dense demo shapes
    b = 8                                          # sublane-aligned batch

    key = jax.random.PRNGKey(0)
    kp, kx, ks, kpro = jax.random.split(key, 4)

    params = init_wcl_params(kp, in_fea, hid_fea)

    doc_fea = jax.random.normal(kx, (b, in_fea), jnp.float32)
    doc_fea_svd = doc_fea + 0.1 * jax.random.normal(ks, (b, in_fea), jnp.float32)
    pro = jax.random.normal(kpro, (b, hid_fea), jnp.float32)
    labels = jnp.array([0, 0, 1, 1, 2, 2, 3, 3], jnp.int32)  # >=2 per class

    total_loss = wcl_forward(params, doc_fea, doc_fea_svd, pro, labels, temperature)
    total_loss = jax.block_until_ready(total_loss)
    assert jnp.isfinite(total_loss), total_loss

    # Loose tolerance vs f32 reference (kernel stages big operands in bf16).
    ref = float(wcl_reference(params, doc_fea, doc_fea_svd, pro, labels, temperature))
    got = float(total_loss)
    assert abs(got - ref) <= 0.05 * abs(ref) + 0.2, (got, ref)

    print("KERNEL_OK")
</pallas_src>

<mosaic_0001>
module attributes {stable_mosaic.version = 11 : i64} {
  func.func @_projector_kernel(%arg0: i32, %arg1: memref<8x128xbf16, #tpu.memory_space<vmem>>, %arg2: memref<8x128xbf16, #tpu.memory_space<vmem>>, %arg3: memref<128x128xbf16, #tpu.memory_space<vmem>>, %arg4: memref<8x128xbf16, #tpu.memory_space<vmem>>, %arg5: memref<1x128xf32, #tpu.memory_space<vmem>>, %arg6: memref<1x128xf32, #tpu.memory_space<vmem>>, %arg7: memref<1x128xf32, #tpu.memory_space<vmem>>, %arg8: memref<128x128xbf16, #tpu.memory_space<vmem>>, %arg9: memref<1x128xf32, #tpu.memory_space<vmem>>, %arg10: memref<8x128xbf16, #tpu.memory_space<vmem>>, %arg11: memref<8x128xbf16, #tpu.memory_space<vmem>>, %arg12: memref<1x128xf32, #tpu.memory_space<vmem>>, %arg13: memref<8x128xf32, #tpu.memory_space<vmem>>, %arg14: memref<8x128xf32, #tpu.memory_space<vmem>>) attributes {dimension_semantics = [#tpu.dimension_semantics<arbitrary>], iteration_bounds = array<i64: 1>, scalar_prefetch = 0 : i64, scratch_operands = 2 : i64, tpu.core_type = #tpu.core_type<tc>, window_params = [{transform_indices = @transform_0, window_bounds = array<i64: 8, 128>}, {transform_indices = @transform_1, window_bounds = array<i64: 8, 128>}, {transform_indices = @transform_2, window_bounds = array<i64: 128, 128>}, {pipeline_mode = #tpu.pipeline_mode<synchronous>, transform_indices = @transform_3, window_bounds = array<i64: 8, 128>}, {pipeline_mode = #tpu.pipeline_mode<synchronous>, transform_indices = @transform_4, window_bounds = array<i64: 1, 128>}, {pipeline_mode = #tpu.pipeline_mode<synchronous>, transform_indices = @transform_5, window_bounds = array<i64: 1, 128>}, {pipeline_mode = #tpu.pipeline_mode<synchronous>, transform_indices = @transform_6, window_bounds = array<i64: 1, 128>}, {pipeline_mode = #tpu.pipeline_mode<synchronous>, transform_indices = @transform_7, window_bounds = array<i64: 128, 128>}, {pipeline_mode = #tpu.pipeline_mode<synchronous>, transform_indices = @transform_8, window_bounds = array<i64: 1, 128>}, {pipeline_mode = #tpu.pipeline_mode<synchronous>, transform_indices = @transform_9, window_bounds = array<i64: 8, 128>}, {pipeline_mode = #tpu.pipeline_mode<synchronous>, transform_indices = @transform_10, window_bounds = array<i64: 8, 128>}, {pipeline_mode = #tpu.pipeline_mode<synchronous>, transform_indices = @transform_11, window_bounds = array<i64: 1, 128>}]} {
    %c0_i32 = arith.constant 0 : i32
    %0 = arith.cmpi eq, %arg0, %c0_i32 : i32
    %1 = arith.extui %0 : i1 to i32
    %c0_i32_0 = arith.constant 0 : i32
    %2 = arith.cmpi ne, %1, %c0_i32_0 : i32
    scf.if %2 {
      %cst_17 = arith.constant 0.000000e+00 : f32
      %17 = vector.broadcast %cst_17 : f32 to vector<8x128xf32>
      %c0_18 = arith.constant 0 : index
      %c0_19 = arith.constant 0 : index
      %18 = vector.load %arg13[%c0_18, %c0_19] : memref<8x128xf32, #tpu.memory_space<vmem>>, vector<8x128xf32>
      tpu.vector_store %arg13[%c0_18, %c0_19], %17 {strides = array<i32>} : memref<8x128xf32, #tpu.memory_space<vmem>>, vector<8x128xf32>,
      %cst_20 = arith.constant 0.000000e+00 : f32
      %19 = vector.broadcast %cst_20 : f32 to vector<8x128xf32>
      %c0_21 = arith.constant 0 : index
      %c0_22 = arith.constant 0 : index
      %20 = vector.load %arg14[%c0_21, %c0_22] : memref<8x128xf32, #tpu.memory_space<vmem>>, vector<8x128xf32>
      tpu.vector_store %arg14[%c0_21, %c0_22], %19 {strides = array<i32>} : memref<8x128xf32, #tpu.memory_space<vmem>>, vector<8x128xf32>,
    } else {
    }
    %c0 = arith.constant 0 : index
    %c0_1 = arith.constant 0 : index
    %3 = vector.load %arg3[%c0, %c0_1] : memref<128x128xbf16, #tpu.memory_space<vmem>>, vector<128x128xbf16>
    %c0_2 = arith.constant 0 : index
    %c0_3 = arith.constant 0 : index
    %4 = vector.load %arg13[%c0_2, %c0_3] : memref<8x128xf32, #tpu.memory_space<vmem>>, vector<8x128xf32>
    %c0_4 = arith.constant 0 : index
    %c0_5 = arith.constant 0 : index
    %5 = vector.load %arg1[%c0_4, %c0_5] : memref<8x128xbf16, #tpu.memory_space<vmem>>, vector<8x128xbf16>
    %cst = arith.constant dense<0.000000e+00> : vector<8x128xf32>
    %6 = tpu.matmul %5, %3, %cst {dimension_numbers = #tpu.dot_dimension_numbers<[1], [0], [0], [1], [0, 0, 1, 1], [], []>} : vector<8x128xbf16>, vector<128x128xbf16>, vector<8x128xf32> -> vector<8x128xf32>
    %7 = arith.addf %4, %6 : vector<8x128xf32>
    %c0_6 = arith.constant 0 : index
    %c0_7 = arith.constant 0 : index
    %8 = vector.load %arg13[%c0_6, %c0_7] : memref<8x128xf32, #tpu.memory_space<vmem>>, vector<8x128xf32>
    tpu.vector_store %arg13[%c0_6, %c0_7], %7 {strides = array<i32>} : memref<8x128xf32, #tpu.memory_space<vmem>>, vector<8x128xf32>,
    %c0_8 = arith.constant 0 : index
    %c0_9 = arith.constant 0 : index
    %9 = vector.load %arg14[%c0_8, %c0_9] : memref<8x128xf32, #tpu.memory_space<vmem>>, vector<8x128xf32>
    %c0_10 = arith.constant 0 : index
    %c0_11 = arith.constant 0 : index
    %10 = vector.load %arg2[%c0_10, %c0_11] : memref<8x128xbf16, #tpu.memory_space<vmem>>, vector<8x128xbf16>
    %cst_12 = arith.constant dense<0.000000e+00> : vector<8x128xf32>
    %11 = tpu.matmul %10, %3, %cst_12 {dimension_numbers = #tpu.dot_dimension_numbers<[1], [0], [0], [1], [0, 0, 1, 1], [], []>} : vector<8x128xbf16>, vector<128x128xbf16>, vector<8x128xf32> -> vector<8x128xf32>
    %12 = arith.addf %9, %11 : vector<8x128xf32>
    %c0_13 = arith.constant 0 : index
    %c0_14 = arith.constant 0 : index
    %13 = vector.load %arg14[%c0_13, %c0_14] : memref<8x128xf32, #tpu.memory_space<vmem>>, vector<8x128xf32>
    tpu.vector_store %arg14[%c0_13, %c0_14], %12 {strides = array<i32>} : memref<8x128xf32, #tpu.memory_space<vmem>>, vector<8x128xf32>,
    %c0_i32_15 = arith.constant 0 : i32
    %14 = arith.cmpi eq, %arg0, %c0_i32_15 : i32
    %15 = arith.extui %14 : i1 to i32
    %c0_i32_16 = arith.constant 0 : i32
    %16 = arith.cmpi ne, %15, %c0_i32_16 : i32
    scf.if %16 {
      %17 = tpu.iota {dimensions = array<i32: 0>} : vector<8x1xi32>
      %c8_i32 = arith.constant 8 : i32
      %18 = vector.broadcast %c8_i32 : i32 to vector<8x1xi32>
      %19 = arith.cmpi slt, %17, %18 : vector<8x1xi32>
      %c0_17 = arith.constant 0 : index
      %c0_18 = arith.constant 0 : index
      %20 = vector.load %arg5[%c0_17, %c0_18] : memref<1x128xf32, #tpu.memory_space<vmem>>, vector<1x128xf32>
      %c0_19 = arith.constant 0 : index
      %c0_20 = arith.constant 0 : index
      %21 = vector.load %arg6[%c0_19, %c0_20] : memref<1x128xf32, #tpu.memory_space<vmem>>, vector<1x128xf32>
      %c0_21 = arith.constant 0 : index
      %c0_22 = arith.constant 0 : index
      %22 = vector.load %arg7[%c0_21, %c0_22] : memref<1x128xf32, #tpu.memory_space<vmem>>, vector<1x128xf32>
      %c0_23 = arith.constant 0 : index
      %c0_24 = arith.constant 0 : index
      %23 = vector.load %arg8[%c0_23, %c0_24] : memref<128x128xbf16, #tpu.memory_space<vmem>>, vector<128x128xbf16>
      %c0_25 = arith.constant 0 : index
      %c0_26 = arith.constant 0 : index
      %24 = vector.load %arg9[%c0_25, %c0_26] : memref<1x128xf32, #tpu.memory_space<vmem>>, vector<1x128xf32>
      %c0_27 = arith.constant 0 : index
      %c0_28 = arith.constant 0 : index
      %25 = vector.load %arg13[%c0_27, %c0_28] : memref<8x128xf32, #tpu.memory_space<vmem>>, vector<8x128xf32>
      %26 = vector.broadcast %20 : vector<1x128xf32> to vector<8x128xf32>
      %27 = arith.addf %25, %26 : vector<8x128xf32>
      %cst_29 = arith.constant 0.000000e+00 : f32
      %28 = vector.shape_cast %19 : vector<8x1xi1> to vector<8x1xi1>
      %29 = vector.broadcast %28 : vector<8x1xi1> to vector<8x128xi1>
      %30 = vector.broadcast %cst_29 : f32 to vector<8x128xf32>
      %31 = arith.select %29, %27, %30 : vector<8x128xi1>, vector<8x128xf32>
      %cst_30 = arith.constant dense<0.000000e+00> : vector<128xf32>
      %32 = vector.multi_reduction <add>, %31, %cst_30 [0] : vector<8x128xf32> to vector<128xf32>
      %33 = vector.shape_cast %32 : vector<128xf32> to vector<1x128xf32>
      %cst_31 = arith.constant 1.250000e-01 : f32
      %34 = vector.broadcast %cst_31 : f32 to vector<1x128xf32>
      %35 = arith.mulf %33, %34 : vector<1x128xf32>
      %36 = vector.broadcast %35 : vector<1x128xf32> to vector<8x128xf32>
      %37 = arith.subf %27, %36 : vector<8x128xf32>
      %cst_32 = arith.constant 0.000000e+00 : f32
      %38 = vector.shape_cast %19 : vector<8x1xi1> to vector<8x1xi1>
      %39 = vector.broadcast %38 : vector<8x1xi1> to vector<8x128xi1>
      %40 = vector.broadcast %cst_32 : f32 to vector<8x128xf32>
      %41 = arith.select %39, %37, %40 : vector<8x128xi1>, vector<8x128xf32>
      %42 = arith.mulf %41, %41 : vector<8x128xf32>
      %cst_33 = arith.constant dense<0.000000e+00> : vector<128xf32>
      %43 = vector.multi_reduction <add>, %42, %cst_33 [0] : vector<8x128xf32> to vector<128xf32>
      %44 = vector.shape_cast %43 : vector<128xf32> to vector<1x128xf32>
      %cst_34 = arith.constant 1.250000e-01 : f32
      %45 = vector.broadcast %cst_34 : f32 to vector<1x128xf32>
      %46 = arith.mulf %44, %45 : vector<1x128xf32>
      %cst_35 = arith.constant 9.99999974E-6 : f32
      %47 = vector.broadcast %cst_35 : f32 to vector<1x128xf32>
      %48 = arith.addf %46, %47 : vector<1x128xf32>
      %49 = math.rsqrt %48 : vector<1x128xf32>
      %50 = arith.mulf %49, %21 : vector<1x128xf32>
      %51 = vector.broadcast %50 : vector<1x128xf32> to vector<8x128xf32>
      %52 = arith.mulf %37, %51 : vector<8x128xf32>
      %53 = vector.broadcast %22 : vector<1x128xf32> to vector<8x128xf32>
      %54 = arith.addf %52, %53 : vector<8x128xf32>
      %cst_36 = arith.constant 0.000000e+00 : f32
      %55 = vector.broadcast %cst_36 : f32 to vector<8x128xf32>
      %56 = arith.maximumf %54, %55 : vector<8x128xf32>
      %57 = arith.truncf %56 : vector<8x128xf32> to vector<8x128xbf16>
      %cst_37 = arith.constant dense<0.000000e+00> : vector<8x128xf32>
      %58 = tpu.matmul %57, %23, %cst_37 {dimension_numbers = #tpu.dot_dimension_numbers<[1], [0], [0], [1], [0, 0, 1, 1], [], []>} : vector<8x128xbf16>, vector<128x128xbf16>, vector<8x128xf32> -> vector<8x128xf32>
      %59 = vector.broadcast %24 : vector<1x128xf32> to vector<8x128xf32>
      %60 = arith.addf %58, %59 : vector<8x128xf32>
      %61 = arith.mulf %60, %60 : vector<8x128xf32>
      %cst_38 = arith.constant dense<0.000000e+00> : vector<8xf32>
      %62 = vector.multi_reduction <add>, %61, %cst_38 [1] : vector<8x128xf32> to vector<8xf32>
      %63 = vector.shape_cast %62 : vector<8xf32> to vector<8x1xf32>
      %cst_39 = arith.constant 1.000000e-24 : f32
      %64 = vector.broadcast %cst_39 : f32 to vector<8x1xf32>
      %65 = arith.maximumf %63, %64 : vector<8x1xf32>
      %66 = math.rsqrt %65 : vector<8x1xf32>
      %cst_40 = arith.constant 1.41421354 : f32
      %67 = vector.broadcast %cst_40 : f32 to vector<8x1xf32>
      %68 = arith.mulf %66, %67 : vector<8x1xf32>
      %69 = vector.broadcast %68 : vector<8x1xf32> to vector<8x128xf32>
      %70 = arith.mulf %60, %69 : vector<8x128xf32>
      %71 = arith.truncf %70 : vector<8x128xf32> to vector<8x128xbf16>
      %c0_41 = arith.constant 0 : index
      %c0_42 = arith.constant 0 : index
      %72 = vector.load %arg10[%c0_41, %c0_42] : memref<8x128xbf16, #tpu.memory_space<vmem>>, vector<8x128xbf16>
      tpu.vector_store %arg10[%c0_41, %c0_42], %71 {strides = array<i32>} : memref<8x128xbf16, #tpu.memory_space<vmem>>, vector<8x128xbf16>,
      %c0_43 = arith.constant 0 : index
      %c0_44 = arith.constant 0 : index
      %73 = vector.load %arg14[%c0_43, %c0_44] : memref<8x128xf32, #tpu.memory_space<vmem>>, vector<8x128xf32>
      %74 = vector.broadcast %20 : vector<1x128xf32> to vector<8x128xf32>
      %75 = arith.addf %73, %74 : vector<8x128xf32>
      %cst_45 = arith.constant 0.000000e+00 : f32
      %76 = vector.shape_cast %19 : vector<8x1xi1> to vector<8x1xi1>
      %77 = vector.broadcast %76 : vector<8x1xi1> to vector<8x128xi1>
      %78 = vector.broadcast %cst_45 : f32 to vector<8x128xf32>
      %79 = arith.select %77, %75, %78 : vector<8x128xi1>, vector<8x128xf32>
      %cst_46 = arith.constant dense<0.000000e+00> : vector<128xf32>
      %80 = vector.multi_reduction <add>, %79, %cst_46 [0] : vector<8x128xf32> to vector<128xf32>
      %81 = vector.shape_cast %80 : vector<128xf32> to vector<1x128xf32>
      %cst_47 = arith.constant 1.250000e-01 : f32
      %82 = vector.broadcast %cst_47 : f32 to vector<1x128xf32>
      %83 = arith.mulf %81, %82 : vector<1x128xf32>
      %84 = vector.broadcast %83 : vector<1x128xf32> to vector<8x128xf32>
      %85 = arith.subf %75, %84 : vector<8x128xf32>
      %cst_48 = arith.constant 0.000000e+00 : f32
      %86 = vector.shape_cast %19 : vector<8x1xi1> to vector<8x1xi1>
      %87 = vector.broadcast %86 : vector<8x1xi1> to vector<8x128xi1>
      %88 = vector.broadcast %cst_48 : f32 to vector<8x128xf32>
      %89 = arith.select %87, %85, %88 : vector<8x128xi1>, vector<8x128xf32>
      %90 = arith.mulf %89, %89 : vector<8x128xf32>
      %cst_49 = arith.constant dense<0.000000e+00> : vector<128xf32>
      %91 = vector.multi_reduction <add>, %90, %cst_49 [0] : vector<8x128xf32> to vector<128xf32>
      %92 = vector.shape_cast %91 : vector<128xf32> to vector<1x128xf32>
      %cst_50 = arith.constant 1.250000e-01 : f32
      %93 = vector.broadcast %cst_50 : f32 to vector<1x128xf32>
      %94 = arith.mulf %92, %93 : vector<1x128xf32>
      %cst_51 = arith.constant 9.99999974E-6 : f32
      %95 = vector.broadcast %cst_51 : f32 to vector<1x128xf32>
      %96 = arith.addf %94, %95 : vector<1x128xf32>
      %97 = math.rsqrt %96 : vector<1x128xf32>
      %98 = arith.mulf %97, %21 : vector<1x128xf32>
      %99 = vector.broadcast %98 : vector<1x128xf32> to vector<8x128xf32>
      %100 = arith.mulf %85, %99 : vector<8x128xf32>
      %101 = vector.broadcast %22 : vector<1x128xf32> to vector<8x128xf32>
      %102 = arith.addf %100, %101 : vector<8x128xf32>
      %cst_52 = arith.constant 0.000000e+00 : f32
      %103 = vector.broadcast %cst_52 : f32 to vector<8x128xf32>
      %104 = arith.maximumf %102, %103 : vector<8x128xf32>
      %105 = arith.truncf %104 : vector<8x128xf32> to vector<8x128xbf16>
      %cst_53 = arith.constant dense<0.000000e+00> : vector<8x128xf32>
      %106 = tpu.matmul %105, %23, %cst_53 {dimension_numbers = #tpu.dot_dimension_numbers<[1], [0], [0], [1], [0, 0, 1, 1], [], []>} : vector<8x128xbf16>, vector<128x128xbf16>, vector<8x128xf32> -> vector<8x128xf32>
      %107 = vector.broadcast %24 : vector<1x128xf32> to vector<8x128xf32>
      %108 = arith.addf %106, %107 : vector<8x128xf32>
      %109 = arith.mulf %108, %108 : vector<8x128xf32>
      %cst_54 = arith.constant dense<0.000000e+00> : vector<8xf32>
      %110 = vector.multi_reduction <add>, %109, %cst_54 [1] : vector<8x128xf32> to vector<8xf32>
      %111 = vector.shape_cast %110 : vector<8xf32> to vector<8x1xf32>
      %cst_55 = arith.constant 1.000000e-24 : f32
      %112 = vector.broadcast %cst_55 : f32 to vector<8x1xf32>
      %113 = arith.maximumf %111, %112 : vector<8x1xf32>
      %114 = math.rsqrt %113 : vector<8x1xf32>
      %cst_56 = arith.constant 1.41421354 : f32
      %115 = vector.broadcast %cst_56 : f32 to vector<8x1xf32>
      %116 = arith.mulf %114, %115 : vector<8x1xf32>
      %117 = vector.broadcast %116 : vector<8x1xf32> to vector<8x128xf32>
      %118 = arith.mulf %108, %117 : vector<8x128xf32>
      %119 = arith.truncf %118 : vector<8x128xf32> to vector<8x128xbf16>
      %c0_57 = arith.constant 0 : index
      %c0_58 = arith.constant 0 : index
      %120 = vector.load %arg11[%c0_57, %c0_58] : memref<8x128xbf16, #tpu.memory_space<vmem>>, vector<8x128xbf16>
      tpu.vector_store %arg11[%c0_57, %c0_58], %119 {strides = array<i32>} : memref<8x128xbf16, #tpu.memory_space<vmem>>, vector<8x128xbf16>,
      %c0_59 = arith.constant 0 : index
      %c0_60 = arith.constant 0 : index
      %121 = vector.load %arg4[%c0_59, %c0_60] : memref<8x128xbf16, #tpu.memory_space<vmem>>, vector<8x128xbf16>
      %122 = arith.extf %121 : vector<8x128xbf16> to vector<8x128xf32>
      %123 = arith.mulf %122, %122 : vector<8x128xf32>
      %cst_61 = arith.constant dense<0.000000e+00> : vector<8xf32>
      %124 = vector.multi_reduction <add>, %123, %cst_61 [1] : vector<8x128xf32> to vector<8xf32>
      %125 = vector.shape_cast %124 : vector<8xf32> to vector<8x1xf32>
      %cst_62 = arith.constant 1.000000e-24 : f32
      %126 = vector.broadcast %cst_62 : f32 to vector<8x1xf32>
      %127 = arith.maximumf %125, %126 : vector<8x1xf32>
      %128 = arith.divf %125, %127 : vector<8x1xf32>
      %129 = vector.shape_cast %128 : vector<8x1xf32> to vector<1x8x1xf32>
      %cst_63 = arith.constant dense<0.000000e+00> : vector<1xf32>
      %130 = vector.multi_reduction <add>, %129, %cst_63 [1, 2] : vector<1x8x1xf32> to vector<1xf32>
      %131 = vector.shape_cast %130 : vector<1xf32> to vector<1x1x1xf32>
      %132 = vector.extract %131[0, 0, 0] : f32 from vector<1x1x1xf32>
      %cst_64 = arith.constant 5.000000e-03 : f32
      %133 = arith.mulf %cst_64, %132 : f32
      %134 = vector.broadcast %133 : f32 to vector<1x128xf32>
      %c0_65 = arith.constant 0 : index
      %c0_66 = arith.constant 0 : index
      %135 = vector.load %arg12[%c0_65, %c0_66] : memref<1x128xf32, #tpu.memory_space<vmem>>, vector<1x128xf32>
      tpu.vector_store %arg12[%c0_65, %c0_66], %134 {strides = array<i32>} : memref<1x128xf32, #tpu.memory_space<vmem>>, vector<1x128xf32>,
    } else {
    }
    return
  }
  func.func @transform_0(%arg0: i32) -> (i32, i32) {
    %c0_i32 = arith.constant 0 : i32
    %c0_i32_0 = arith.constant 0 : i32
    return %c0_i32, %arg0 : i32, i32
  }
  func.func @transform_1(%arg0: i32) -> (i32, i32) {
    %c0_i32 = arith.constant 0 : i32
    %c0_i32_0 = arith.constant 0 : i32
    return %c0_i32, %arg0 : i32, i32
  }
  func.func @transform_2(%arg0: i32) -> (i32, i32) {
    %c0_i32 = arith.constant 0 : i32
    %c0_i32_0 = arith.constant 0 : i32
    return %arg0, %c0_i32 : i32, i32
  }
  func.func @transform_3(%arg0: i32) -> (i32, i32) {
    %c0_i32 = arith.constant 0 : i32
    %c0_i32_0 = arith.constant 0 : i32
    %c0_i32_1 = arith.constant 0 : i32
    return %c0_i32, %c0_i32_0 : i32, i32
  }
  func.func @transform_4(%arg0: i32) -> (i32, i32) {
    %c0_i32 = arith.constant 0 : i32
    %c0_i32_0 = arith.constant 0 : i32
    %c0_i32_1 = arith.constant 0 : i32
    return %c0_i32, %c0_i32_0 : i32, i32
  }
  func.func @transform_5(%arg0: i32) -> (i32, i32) {
    %c0_i32 = arith.constant 0 : i32
    %c0_i32_0 = arith.constant 0 : i32
    %c0_i32_1 = arith.constant 0 : i32
    return %c0_i32, %c0_i32_0 : i32, i32
  }
  func.func @transform_6(%arg0: i32) -> (i32, i32) {
    %c0_i32 = arith.constant 0 : i32
    %c0_i32_0 = arith.constant 0 : i32
    %c0_i32_1 = arith.constant 0 : i32
    return %c0_i32, %c0_i32_0 : i32, i32
  }
  func.func @transform_7(%arg0: i32) -> (i32, i32) {
    %c0_i32 = arith.constant 0 : i32
    %c0_i32_0 = arith.constant 0 : i32
    %c0_i32_1 = arith.constant 0 : i32
    return %c0_i32, %c0_i32_0 : i32, i32
  }
  func.func @transform_8(%arg0: i32) -> (i32, i32) {
    %c0_i32 = arith.constant 0 : i32
    %c0_i32_0 = arith.constant 0 : i32
    %c0_i32_1 = arith.constant 0 : i32
    return %c0_i32, %c0_i32_0 : i32, i32
  }
  func.func @transform_9(%arg0: i32) -> (i32, i32) {
    %c0_i32 = arith.constant 0 : i32
    %c0_i32_0 = arith.constant 0 : i32
    %c0_i32_1 = arith.constant 0 : i32
    return %c0_i32, %c0_i32_0 : i32, i32
  }
  func.func @transform_10(%arg0: i32) -> (i32, i32) {
    %c0_i32 = arith.constant 0 : i32
    %c0_i32_0 = arith.constant 0 : i32
    %c0_i32_1 = arith.constant 0 : i32
    return %c0_i32, %c0_i32_0 : i32, i32
  }
  func.func @transform_11(%arg0: i32) -> (i32, i32) {
    %c0_i32 = arith.constant 0 : i32
    %c0_i32_0 = arith.constant 0 : i32
    %c0_i32_1 = arith.constant 0 : i32
    return %c0_i32, %c0_i32_0 : i32, i32
  }
}

module attributes {stable_mosaic.version = 11 : i64} {
  func.func @_contrastive_kernel(%arg0: i32, %arg1: memref<8x128xbf16, #tpu.memory_space<vmem>>, %arg2: memref<8x128xbf16, #tpu.memory_space<vmem>>, %arg3: memref<1x8xi32, #tpu.memory_space<vmem>>, %arg4: memref<8x1xi32, #tpu.memory_space<vmem>>, %arg5: memref<1x128xf32, #tpu.memory_space<vmem>>) attributes {dimension_semantics = [#tpu.dimension_semantics<parallel>], iteration_bounds = array<i64: 1>, scalar_prefetch = 0 : i64, scratch_operands = 0 : i64, tpu.core_type = #tpu.core_type<tc>, window_params = [{pipeline_mode = #tpu.pipeline_mode<synchronous>, transform_indices = @transform_0, window_bounds = array<i64: 8, 128>}, {pipeline_mode = #tpu.pipeline_mode<synchronous>, transform_indices = @transform_1, window_bounds = array<i64: 8, 128>}, {pipeline_mode = #tpu.pipeline_mode<synchronous>, transform_indices = @transform_2, window_bounds = array<i64: 1, 8>}, {transform_indices = @transform_3, window_bounds = array<i64: 8, 1>}, {transform_indices = @transform_4, window_bounds = array<i64: 1, 128>}]} {
    %c8_i32 = arith.constant 8 : i32
    %0 = arith.muli %arg0, %c8_i32 : i32
    %1 = tpu.assume_multiple %0, 8 : i32
    %2 = tpu.iota {dimensions = array<i32: 1>} : vector<8x8xi32>
    %3 = tpu.iota {dimensions = array<i32: 0>} : vector<8x1xi32>
    %4 = vector.broadcast %1 : i32 to vector<8x1xi32>
    %5 = arith.addi %4, %3 : vector<8x1xi32>
    %6 = vector.broadcast %5 : vector<8x1xi32> to vector<8x8xi32>
    %7 = arith.cmpi ne, %2, %6 : vector<8x8xi32>
    %c8_i32_0 = arith.constant 8 : i32
    %8 = vector.broadcast %c8_i32_0 : i32 to vector<8x8xi32>
    %9 = arith.cmpi slt, %2, %8 : vector<8x8xi32>
    %10 = arith.andi %7, %9 : vector<8x8xi1>
    %c8_i32_1 = arith.constant 8 : i32
    %11 = vector.broadcast %c8_i32_1 : i32 to vector<8x1xi32>
    %12 = arith.cmpi slt, %5, %11 : vector<8x1xi32>
    %c0 = arith.constant 0 : index
    %c0_2 = arith.constant 0 : index
    %13 = vector.load %arg4[%c0, %c0_2] : memref<8x1xi32, #tpu.memory_space<vmem>>, vector<8x1xi32>
    %c0_3 = arith.constant 0 : index
    %c0_4 = arith.constant 0 : index
    %14 = vector.load %arg3[%c0_3, %c0_4] : memref<1x8xi32, #tpu.memory_space<vmem>>, vector<1x8xi32>
    %15 = vector.broadcast %13 : vector<8x1xi32> to vector<8x8xi32>
    %16 = vector.broadcast %14 : vector<1x8xi32> to vector<8x8xi32>
    %17 = arith.cmpi eq, %15, %16 : vector<8x8xi32>
    %18 = arith.andi %17, %10 : vector<8x8xi1>
    %cst = arith.constant 1.000000e+00 : f32
    %cst_5 = arith.constant 0.000000e+00 : f32
    %19 = vector.broadcast %cst : f32 to vector<8x8xf32>
    %20 = vector.broadcast %cst_5 : f32 to vector<8x8xf32>
    %21 = arith.select %18, %19, %20 : vector<8x8xi1>, vector<8x8xf32>
    %cst_6 = arith.constant dense<0.000000e+00> : vector<8xf32>
    %22 = vector.multi_reduction <add>, %21, %cst_6 [1] : vector<8x8xf32> to vector<8xf32>
    %23 = vector.shape_cast %22 : vector<8xf32> to vector<8x1xf32>
    %cst_7 = arith.constant 1.000000e+00 : f32
    %24 = vector.broadcast %cst_7 : f32 to vector<8x1xf32>
    %25 = arith.divf %24, %23 : vector<8x1xf32>
    %26 = arith.index_cast %1 : i32 to index
    %c0_8 = arith.constant 0 : index
    %27 = vector.load %arg1[%26, %c0_8] : memref<8x128xbf16, #tpu.memory_space<vmem>>, vector<8x128xbf16>
    %c0_9 = arith.constant 0 : index
    %c0_10 = arith.constant 0 : index
    %28 = vector.load %arg1[%c0_9, %c0_10] : memref<8x128xbf16, #tpu.memory_space<vmem>>, vector<8x128xbf16>
    %cst_11 = arith.constant dense<0.000000e+00> : vector<8x8xf32>
    %29 = tpu.matmul %27, %28, %cst_11 {dimension_numbers = #tpu.dot_dimension_numbers<[1], [1], [0], [0], [0, 0, 1, 0], [], []>} : vector<8x128xbf16>, vector<8x128xbf16>, vector<8x8xf32> -> vector<8x8xf32>
    %cst_12 = arith.constant dense<0xFF800000> : vector<8xf32>
    %30 = vector.multi_reduction <maximumf>, %29, %cst_12 [1] : vector<8x8xf32> to vector<8xf32>
    %31 = vector.shape_cast %30 : vector<8xf32> to vector<8x1xf32>
    %32 = vector.broadcast %31 : vector<8x1xf32> to vector<8x8xf32>
    %33 = arith.subf %29, %32 : vector<8x8xf32>
    %34 = math.exp %33 : vector<8x8xf32>
    %cst_13 = arith.constant 0.000000e+00 : f32
    %35 = vector.broadcast %cst_13 : f32 to vector<8x8xf32>
    %36 = arith.select %10, %34, %35 : vector<8x8xi1>, vector<8x8xf32>
    %cst_14 = arith.constant dense<0.000000e+00> : vector<8xf32>
    %37 = vector.multi_reduction <add>, %36, %cst_14 [1] : vector<8x8xf32> to vector<8xf32>
    %38 = vector.shape_cast %37 : vector<8xf32> to vector<8x1xf32>
    %39 = math.log %38 : vector<8x1xf32>
    %40 = arith.addf %39, %31 : vector<8x1xf32>
    %cst_15 = arith.constant 0.000000e+00 : f32
    %41 = vector.broadcast %cst_15 : f32 to vector<8x8xf32>
    %42 = arith.select %18, %29, %41 : vector<8x8xi1>, vector<8x8xf32>
    %cst_16 = arith.constant dense<0.000000e+00> : vector<8xf32>
    %43 = vector.multi_reduction <add>, %42, %cst_16 [1] : vector<8x8xf32> to vector<8xf32>
    %44 = vector.shape_cast %43 : vector<8xf32> to vector<8x1xf32>
    %45 = arith.mulf %23, %40 : vector<8x1xf32>
    %46 = arith.subf %44, %45 : vector<8x1xf32>
    %cst_17 = arith.constant 0.000000e+00 : f32
    %47 = vector.broadcast %cst_17 : f32 to vector<8x1xf32>
    %48 = arith.subf %47, %46 : vector<8x1xf32>
    %49 = arith.mulf %48, %25 : vector<8x1xf32>
    %cst_18 = arith.constant 0.000000e+00 : f32
    %50 = vector.broadcast %cst_18 : f32 to vector<8x1xf32>
    %51 = arith.select %12, %49, %50 : vector<8x1xi1>, vector<8x1xf32>
    %52 = vector.shape_cast %51 : vector<8x1xf32> to vector<1x8x1xf32>
    %cst_19 = arith.constant dense<0.000000e+00> : vector<1xf32>
    %53 = vector.multi_reduction <add>, %52, %cst_19 [1, 2] : vector<1x8x1xf32> to vector<1xf32>
    %54 = vector.shape_cast %53 : vector<1xf32> to vector<1x1x1xf32>
    %55 = vector.extract %54[0, 0, 0] : f32 from vector<1x1x1xf32>
    %56 = arith.index_cast %1 : i32 to index
    %c0_20 = arith.constant 0 : index
    %57 = vector.load %arg2[%56, %c0_20] : memref<8x128xbf16, #tpu.memory_space<vmem>>, vector<8x128xbf16>
    %c0_21 = arith.constant 0 : index
    %c0_22 = arith.constant 0 : index
    %58 = vector.load %arg2[%c0_21, %c0_22] : memref<8x128xbf16, #tpu.memory_space<vmem>>, vector<8x128xbf16>
    %cst_23 = arith.constant dense<0.000000e+00> : vector<8x8xf32>
    %59 = tpu.matmul %57, %58, %cst_23 {dimension_numbers = #tpu.dot_dimension_numbers<[1], [1], [0], [0], [0, 0, 1, 0], [], []>} : vector<8x128xbf16>, vector<8x128xbf16>, vector<8x8xf32> -> vector<8x8xf32>
    %cst_24 = arith.constant dense<0xFF800000> : vector<8xf32>
    %60 = vector.multi_reduction <maximumf>, %59, %cst_24 [1] : vector<8x8xf32> to vector<8xf32>
    %61 = vector.shape_cast %60 : vector<8xf32> to vector<8x1xf32>
    %62 = vector.broadcast %61 : vector<8x1xf32> to vector<8x8xf32>
    %63 = arith.subf %59, %62 : vector<8x8xf32>
    %64 = math.exp %63 : vector<8x8xf32>
    %cst_25 = arith.constant 0.000000e+00 : f32
    %65 = vector.broadcast %cst_25 : f32 to vector<8x8xf32>
    %66 = arith.select %10, %64, %65 : vector<8x8xi1>, vector<8x8xf32>
    %cst_26 = arith.constant dense<0.000000e+00> : vector<8xf32>
    %67 = vector.multi_reduction <add>, %66, %cst_26 [1] : vector<8x8xf32> to vector<8xf32>
    %68 = vector.shape_cast %67 : vector<8xf32> to vector<8x1xf32>
    %69 = math.log %68 : vector<8x1xf32>
    %70 = arith.addf %69, %61 : vector<8x1xf32>
    %cst_27 = arith.constant 0.000000e+00 : f32
    %71 = vector.broadcast %cst_27 : f32 to vector<8x8xf32>
    %72 = arith.select %18, %59, %71 : vector<8x8xi1>, vector<8x8xf32>
    %cst_28 = arith.constant dense<0.000000e+00> : vector<8xf32>
    %73 = vector.multi_reduction <add>, %72, %cst_28 [1] : vector<8x8xf32> to vector<8xf32>
    %74 = vector.shape_cast %73 : vector<8xf32> to vector<8x1xf32>
    %75 = arith.mulf %23, %70 : vector<8x1xf32>
    %76 = arith.subf %74, %75 : vector<8x1xf32>
    %cst_29 = arith.constant 0.000000e+00 : f32
    %77 = vector.broadcast %cst_29 : f32 to vector<8x1xf32>
    %78 = arith.subf %77, %76 : vector<8x1xf32>
    %79 = arith.mulf %78, %25 : vector<8x1xf32>
    %cst_30 = arith.constant 0.000000e+00 : f32
    %80 = vector.broadcast %cst_30 : f32 to vector<8x1xf32>
    %81 = arith.select %12, %79, %80 : vector<8x1xi1>, vector<8x1xf32>
    %82 = vector.shape_cast %81 : vector<8x1xf32> to vector<1x8x1xf32>
    %cst_31 = arith.constant dense<0.000000e+00> : vector<1xf32>
    %83 = vector.multi_reduction <add>, %82, %cst_31 [1, 2] : vector<1x8x1xf32> to vector<1xf32>
    %84 = vector.shape_cast %83 : vector<1xf32> to vector<1x1x1xf32>
    %85 = vector.extract %84[0, 0, 0] : f32 from vector<1x1x1xf32>
    %86 = arith.addf %55, %85 : f32
    %87 = vector.broadcast %86 : f32 to vector<1x128xf32>
    %c0_32 = arith.constant 0 : index
    %c0_33 = arith.constant 0 : index
    %88 = vector.load %arg5[%c0_32, %c0_33] : memref<1x128xf32, #tpu.memory_space<vmem>>, vector<1x128xf32>
    tpu.vector_store %arg5[%c0_32, %c0_33], %87 {strides = array<i32>} : memref<1x128xf32, #tpu.memory_space<vmem>>, vector<1x128xf32>,
    return
  }
  func.func @transform_0(%arg0: i32) -> (i32, i32) {
    %c0_i32 = arith.constant 0 : i32
    %c0_i32_0 = arith.constant 0 : i32
    %c0_i32_1 = arith.constant 0 : i32
    return %c0_i32, %c0_i32_0 : i32, i32
  }
  func.func @transform_1(%arg0: i32) -> (i32, i32) {
    %c0_i32 = arith.constant 0 : i32
    %c0_i32_0 = arith.constant 0 : i32
    %c0_i32_1 = arith.constant 0 : i32
    return %c0_i32, %c0_i32_0 : i32, i32
  }
  func.func @transform_2(%arg0: i32) -> (i32, i32) {
    %c0_i32 = arith.constant 0 : i32
    %c0_i32_0 = arith.constant 0 : i32
    %c0_i32_1 = arith.constant 0 : i32
    return %c0_i32, %c0_i32_0 : i32, i32
  }
  func.func @transform_3(%arg0: i32) -> (i32, i32) {
    %c0_i32 = arith.constant 0 : i32
    %c0_i32_0 = arith.constant 0 : i32
    return %arg0, %c0_i32 : i32, i32
  }
  func.func @transform_4(%arg0: i32) -> (i32, i32) {
    %c0_i32 = arith.constant 0 : i32
    %c0_i32_0 = arith.constant 0 : i32
    return %arg0, %c0_i32 : i32, i32
  }
}

</mosaic_0001>

<bundles_post_ra>
// kernel: wcl_forward.3
= control target key start
LH: loop header
LB: loop body
LE: loop exit
PB: predicated region body
PF: predicated region fallthrough
CT: control target
= control target key end

     0   :  { %v188_v2 = vmov 0   ;;  %v19_v6 = vlaneseq  ;;  %vm38_vm0 = vcmask 64512   ;;  %v189_v21 = vmov 0.0   ;;  %s263_s0 = inlined_call_operand.vmem [shape: bf16[8,128], index: 0, kind: input, shape index: {}]   ;;  %s264_s1 = inlined_call_operand.vmem [shape: bf16[8,128], index: 1, kind: input, shape index: {}]   ;;  %s265_s3 = inlined_call_operand.vmem [shape: s32[8,1], index: 3, kind: input, shape index: {}]   ;;  %s266_s2 = inlined_call_operand.vmem [shape: s32[1,8], index: 2, kind: input, shape index: {}]   ;;  %s267_s4 = inlined_call_operand.vmem [shape: f32[1,128], index: 4, kind: output, shape index: {}]  }
   0x1   :  { %v62_v0 = vld [vmem:[%s263_s0] sm:$0xf]  ;;  %175 = vset.pattern.permute.xlu1 %v188_v2  ;;  %176 = vset.pattern.permute.xlu0 %v188_v2  ;;  %vm98_vm10 = vcmask 7168  }
   0x2   :  { %v112_v1 = vld [vmem:[%s264_s1] sm:$0xf]  ;;  %70 = vmatpush.bf16.xpose.msra.mxu0 %v62_v0  ;;  %v20_v9 = vand.u32 127, %v19_v6  ;;  %v22_v10 = vshrl.u32 %v19_v6, 7 }
   0x3   :  { %120 = vmatpush.bf16.xpose.msra.mxu1 %v112_v1  ;;  %v29_v3 = vld [vmem:[%s265_s3] sm:$0xff] }
   0x4   :  { %32 = vperm.xlu1 %175, %v29_v3   ;;  %v61_v4 = vld [vmem:[%s263_s0] sm:$0xf]  ;;  %vm25_vm1 = vcmp.ne.s32.totalorder %v20_v9, %v22_v10  ;;  %vm26_vm2 = vcmp.lt.s32.totalorder %v20_v9, 8 }
   0x5   :  { %v111_v5 = vld [vmem:[%s264_s1] sm:$0xf]  ;;  %vm235_vm3 = vmand %vm25_vm1, %vm26_vm2 }
   0x6   :  { %v177_v12 = vld [vmem:[%s266_s2] ss:$0 sm:$0xff] }
   0x9   :  { %71 = vmatmul.bf16.vlgmr.msra.gmra.mxu0 %v61_v4 }
   0xa   :  { %121 = vmatmul.bf16.vlgmr.msra.gmra.mxu1 %v111_v5 }
  0x76   :  { %v33_v13 = vpop.permute.xlu1 %32 }
  0x77   :  { %vm35_vm4 = vcmp.eq.s32.totalorder %v33_v13, %v177_v12 }
  0x78   :  { %vm241_vm5 = vmand %vm35_vm4, %vm235_vm3 }
  0x79   :  { %v37_v22 = vsel %vm241_vm5, 1.0, %v189_v21 }
  0x7a   :  { %v39_v23 = vsel %vm38_vm0, %v37_v22, 0.0 }
  0x7b   :  { %40 = vadd.xlane.f32.xlu1 %v39_v23 }
  0x86   :  { %v72_v7 = vpop.f32.mrf.mxu0 }
  0x87   :  { %v122_v8 = vpop.f32.mrf.mxu1  ;;  %v76_v11 = vsel %vm38_vm0, %v72_v7, -inf  ;;  %v89_v19 = vsel %vm241_vm5, %v72_v7, 0.0 }
  0x88   :  { %77 = vmax.xlane.f32.xlu0 %v76_v11  ;;  %v126_v14 = vsel %vm38_vm0, %v122_v8, -inf  ;;  %v90_v20 = vsel %vm38_vm0, %v89_v19, 0.0  ;;  %v139_v36 = vsel %vm241_vm5, %v122_v8, 0.0 }
  0x89   :  { %v140_v37 = vsel %vm38_vm0, %v139_v36, 0.0 }
  0x8e   :  { %v74_v16 = vpop.f32.mrf.mxu0 }
  0x8f   :  { %v124_v17 = vpop.f32.mrf.mxu1 }
  0x90   :  { %127 = vmax.xlane.f32.xlu0 %v126_v14 }
  0x98   :  { %91 = vadd.xlane.f32.xlu0 %v90_v20 }
  0xee   :  { %v41_v38 = vpop.xlane.xlu1 %40 }
  0xef   :  { %vm47_vm6 = vweird.f32 %v41_v38  ;;  %v53_v47 = vand.u32 2147483648, %v41_v38  ;;  %v51_v50 = vand.u32 2147483647, %v41_v38 }
  0xf1   :  { %v54_v53 = vor.u32 1.1754944e-38, %v53_v47  ;;  %vm52_vm9 = vcmp.eq.f32.partialorder %v51_v50, 8.507059e+37 }
  0xfb   :  { %v78_v24 = vpop.xlane.xlu0 %77 }
  0xfc   :  { %v79_v25 = vsub.f32 %v72_v7, %v78_v24 }
  0xfe   :  { %v80_v26 = vmul.f32 1.442695, %v79_v25 }
 0x100   :  { %178 = vpow2.f32 %v80_v26 }
 0x103   :  { %v128_v27 = vpop.xlane.xlu0 %127 }
 0x104   :  { %v129_v28 = vsub.f32 %v122_v8, %v128_v27 }
 0x106   :  { %v179_v29 = vpop.eup %178  ;;  %v130_v30 = vmul.f32 1.442695, %v129_v28 }
 0x107   :  { %v82_v31 = vsel %vm235_vm3, %v179_v29, 0.0 }
 0x108   :  { %180 = vpow2.f32 %v130_v30  ;;  %v83_v32 = vsel %vm38_vm0, %v82_v31, 0.0 }
 0x109   :  { %84 = vadd.xlane.f32.xlu2 %v83_v32  ;;  %182 = vrcp.f32 %v41_v38 }
 0x10b   :  { %v92_v52 = vpop.xlane.xlu0 %91 }
 0x10e   :  { %v181_v33 = vpop.eup %180 }
 0x10f   :  { %v132_v34 = vsel %vm235_vm3, %v181_v33, 0.0  ;;  %v183_v39 = vpop.eup %182 }
 0x110   :  { %v133_v35 = vsel %vm38_vm0, %v132_v34, 0.0  ;;  %v43_v40 = vmul.f32 %v183_v39, %v41_v38  ;;  %vm48_vm7 = vweird.f32 %v183_v39 }
 0x111   :  { %134 = vadd.xlane.f32.xlu2 %v133_v35  ;;  %vm49_vm8 = vmor %vm47_vm6, %vm48_vm7 }
 0x112   :  { %v44_v42 = vsub.f32 1.0, %v43_v40 }
 0x114   :  { %v45_v43 = vmul.f32 %v183_v39, %v44_v42 }
 0x116   :  { %v46_v49 = vadd.f32 %v183_v39, %v45_v43 }
 0x118   :  { %v50_v54 = vsel %vm49_vm8, %v183_v39, %v46_v49 }
 0x119   :  { %141 = vadd.xlane.f32.xlu2 %v140_v37  ;;  %v55_v59 = vsel %vm52_vm9, %v54_v53, %v50_v54 }
 0x17c   :  { %v85_v41 = vpop.xlane.xlu2 %84 }
 0x17d   :  { %184 = vlog2.f32 %v85_v41 }
 0x183   :  { %v185_v44 = vpop.eup %184 }
 0x184   :  { %v87_v45 = vmul.f32 0.6931472, %v185_v44  ;;  %v135_v46 = vpop.xlane.xlu2 %134 }
 0x185   :  { %186 = vlog2.f32 %v135_v46 }
 0x186   :  { %v88_v48 = vadd.f32 %v87_v45, %v78_v24 }
 0x188   :  { %v93_v51 = vmul.f32 %v88_v48, %v41_v38 }
 0x18a   :  { %v94_v55 = vsub.f32 %v92_v52, %v93_v51 }
 0x18b   :  { %v187_v56 = vpop.eup %186 }
 0x18c   :  { %v137_v57 = vmul.f32 0.6931472, %v187_v56  ;;  %v95_v58 = vsub.f32 0.0, %v94_v55  ;;  %v142_v0 = vpop.xlane.xlu2 %141 }
 0x18e   :  { %v138_v60 = vadd.f32 %v137_v57, %v128_v27  ;;  %v96_v61 = vmul.f32 %v95_v58, %v55_v59 }
 0x190   :  { %v143_v62 = vmul.f32 %v138_v60, %v41_v38  ;;  %v99_v63 = vsel %vm98_vm10, %v96_v61, 0.0 }
 0x191   :  { %100 = vadd.xlane.f32.xlu0 %v99_v63 }
 0x192   :  { %v144_v1 = vsub.f32 %v142_v0, %v143_v62 }
 0x194   :  { %v145_v2 = vsub.f32 0.0, %v144_v1 }
 0x196   :  { %v146_v3 = vmul.f32 %v145_v2, %v55_v59 }
 0x198   :  { %v148_v4 = vsel %vm98_vm10, %v146_v3, 0.0 }
 0x199   :  { %149 = vadd.xlane.f32.xlu2 %v148_v4 }
 0x204   :  { %v101_v5 = vpop.xlane.xlu0 %100 }
 0x205   :  { %v102_v6 = vrot.slane %v101_v5, 4 }
 0x207   :  { %v103_v7 = vadd.f32 %v102_v6, %v101_v5 }
 0x209   :  { %v104_v8 = vrot.slane %v103_v7, 2 }
 0x20b   :  { %v105_v9 = vadd.f32 %v104_v8, %v103_v7 }
 0x20c   :  { %v150_v10 = vpop.xlane.xlu2 %149 }
 0x20d   :  { %v151_v11 = vrot.slane %v150_v10, 4  ;;  %v106_v12 = vrot.slane %v105_v9, 1 }
 0x20f   :  { %v152_v13 = vadd.f32 %v151_v11, %v150_v10  ;;  %v107_v14 = vadd.f32 %v106_v12, %v105_v9 }
 0x211   :  { %v153_v15 = vrot.slane %v152_v13, 2  ;;  %169 = vpush %v107_v14 }
 0x213   :  { %v154_v16 = vadd.f32 %v153_v15, %v152_v13 }
 0x215   :  { %v155_v17 = vrot.slane %v154_v16, 1 }
 0x217   :  { %v156_v18 = vadd.f32 %v155_v17, %v154_v16 }
 0x219   :  { %171 = vpush %v156_v18 }
 0x242   :  { %s170_s0 = spop %169 }
 0x24a   :  { %s172_s1 = spop %171 }
 0x24b   :  { %s158_s2 = sadd.f32 %s172_s1, %s170_s0 }
 0x24d   :  { %v159_v19 = vstv %s158_s2 }
 0x24e   :  { %160 = vst [vmem:[%s267_s4] sm:$0x1] %v159_v19 }

// kernel: wcl_forward.2
= control target key start
LH: loop header
LB: loop body
LE: loop exit
PB: predicated region body
PF: predicated region fallthrough
CT: control target
= control target key end

     0   :  { %vm381_vm10 = vcmask 7168   ;;  %s650_s2 = inlined_call_operand.vmem [shape: bf16[128,128], index: 2, kind: input, shape index: {}]   ;;  %s651_s4 = inlined_call_operand.vmem [shape: f32[1,128], index: 4, kind: input, shape index: {}]   ;;  %s652_s0 = inlined_call_operand.vmem [shape: bf16[8,128], index: 0, kind: input, shape index: {}]   ;;  %s653_s1 = inlined_call_operand.vmem [shape: bf16[8,128], index: 1, kind: input, shape index: {}]   ;;  %s654_s6 = inlined_call_operand.vmem [shape: f32[1,128], index: 6, kind: input, shape index: {}]   ;;  %s655_s3 = inlined_call_operand.vmem [shape: bf16[8,128], index: 3, kind: input, shape index: {}]   ;;  %s656_s8 = inlined_call_operand.vmem [shape: f32[1,128], index: 8, kind: input, shape index: {}]   ;;  %s657_s7 = inlined_call_operand.vmem [shape: bf16[128,128], index: 7, kind: input, shape index: {}]   ;;  %s658_s5 = inlined_call_operand.vmem [shape: f32[1,128], index: 5, kind: input, shape index: {}]   ;;  %s659_s11 = inlined_call_operand.vmem [shape: f32[1,128], index: 11, kind: output, shape index: {2}]   ;;  %s660_s9 = inlined_call_operand.vmem [shape: bf16[8,128], index: 9, kind: output, shape index: {0}]   ;;  %s661_s10 = inlined_call_operand.vmem [shape: bf16[8,128], index: 10, kind: output, shape index: {1}]  }
   0x1   :  { %v478_v0 = vld [vmem:[%s650_s2 + $0x38] sm:$0xff]  ;;  %v477_v1 = vld [vmem:[%s650_s2 + $0x30] sm:$0xff]  ;;  %v476_v2 = vld [vmem:[%s650_s2 + $0x28] sm:$0xff] }
   0x2   :  { %107 = vmatpush.bf16.msra.mxu0 %v478_v0  ;;  %124 = vmatpush.bf16.msra.mxu1 %v478_v0  ;;  %v475_v3 = vld [vmem:[%s650_s2 + $0x20] sm:$0xff]  ;;  %v474_v4 = vld [vmem:[%s650_s2 + $0x18] sm:$0xff]  ;;  %v473_v5 = vld [vmem:[%s650_s2 + $0x10] sm:$0xff] }
   0x3   :  { %v472_v6 = vld [vmem:[%s650_s2 + $0x8] sm:$0xff]  ;;  %v471_v7 = vld [vmem:[%s650_s2] sm:$0xff]  ;;  %v486_v20 = vld [vmem:[%s657_s7 + $0x38] sm:$0xff] }
   0x4   :  { %v58_v8 = vld [vmem:[%s652_s0] sm:$0xf]  ;;  %261 = vmatpush.bf16.msra.mxu2 %v486_v20  ;;  %329 = vmatpush.bf16.msra.mxu3 %v486_v20  ;;  %v485_v23 = vld [vmem:[%s657_s7 + $0x30] sm:$0xff]  ;;  %v484_v30 = vld [vmem:[%s657_s7 + $0x28] sm:$0xff] }
   0x5   :  { %v123_v9 = vld [vmem:[%s653_s1] sm:$0xf]  ;;  %v482_v40 = vld [vmem:[%s657_s7 + $0x18] sm:$0xff]  ;;  %v481_v45 = vld [vmem:[%s657_s7 + $0x10] sm:$0xff] }
   0x6   :  { %108 = vmatpush.bf16.msra.mxu0 %v477_v1  ;;  %125 = vmatpush.bf16.msra.mxu1 %v477_v1  ;;  %v360_v10 = vld [vmem:[%s655_s3] sm:$0xf]  ;;  %v480_v50 = vld [vmem:[%s657_s7 + $0x8] sm:$0xff] }
   0x7   :  { %v361_v11 = vunpack.c.l.bf16 %v360_v10  ;;  %v489_v13 = vld [vmem:[%s651_s4] ss:$0 sm:$0xff] }
   0x8   :  { %262 = vmatpush.bf16.msra.mxu2 %v485_v23  ;;  %330 = vmatpush.bf16.msra.mxu3 %v485_v23  ;;  %v483_v35 = vld [vmem:[%s657_s7 + $0x20] sm:$0xff] }
   0x9   :  { %v362_v12 = vmul.f32 %v361_v11, %v361_v11  ;;  %v479_v55 = vld [vmem:[%s657_s7] sm:$0xff] }
   0xa   :  { %109 = vmatpush.bf16.msra.mxu0 %v476_v2  ;;  %126 = vmatpush.bf16.msra.mxu1 %v476_v2 }
   0xb   :  { %363 = vadd.xlane.f32.xlu0 %v362_v12 }
   0xc   :  { %263 = vmatpush.bf16.msra.mxu2 %v484_v30  ;;  %331 = vmatpush.bf16.msra.mxu3 %v484_v30 }
   0xe   :  { %110 = vmatpush.bf16.msra.mxu0 %v475_v3  ;;  %127 = vmatpush.bf16.msra.mxu1 %v475_v3 }
  0x10   :  { %264 = vmatpush.bf16.msra.mxu2 %v483_v35  ;;  %332 = vmatpush.bf16.msra.mxu3 %v483_v35 }
  0x12   :  { %111 = vmatpush.bf16.msra.mxu0 %v474_v4  ;;  %128 = vmatpush.bf16.msra.mxu1 %v474_v4 }
  0x14   :  { %265 = vmatpush.bf16.msra.mxu2 %v482_v40  ;;  %333 = vmatpush.bf16.msra.mxu3 %v482_v40  ;;  %v491_v40 = vld [vmem:[%s656_s8] ss:$0 sm:$0xff] }
  0x16   :  { %112 = vmatpush.bf16.msra.mxu0 %v473_v5  ;;  %129 = vmatpush.bf16.msra.mxu1 %v473_v5 }
  0x18   :  { %266 = vmatpush.bf16.msra.mxu2 %v481_v45  ;;  %334 = vmatpush.bf16.msra.mxu3 %v481_v45 }
  0x1a   :  { %113 = vmatpush.bf16.msra.mxu0 %v472_v6  ;;  %130 = vmatpush.bf16.msra.mxu1 %v472_v6 }
  0x1c   :  { %267 = vmatpush.bf16.msra.mxu2 %v480_v50  ;;  %335 = vmatpush.bf16.msra.mxu3 %v480_v50 }
  0x1e   :  { %114 = vmatpush.bf16.msra.mxu0 %v471_v7  ;;  %131 = vmatpush.bf16.msra.mxu1 %v471_v7 }
  0x20   :  { %268 = vmatpush.bf16.msra.mxu2 %v479_v55  ;;  %336 = vmatpush.bf16.msra.mxu3 %v479_v55 }
  0x21   :  { %115 = vmatmul.bf16.vlgmr.msra.gmra.mxu0 %v58_v8  ;;  %132 = vmatmul.bf16.vlgmr.msra.gmra.mxu1 %v123_v9  ;;  %v146_v8 = vld [vmem:[%s658_s5] sm:$0x1] }
  0x9e   :  { %v116_v14 = vpop.f32.mrf.mxu0  ;;  %v133_v15 = vpop.f32.mrf.mxu1 }
  0x9f   :  { %v169_v16 = vadd.f32 %v489_v13, %v116_v14  ;;  %v293_v17 = vadd.f32 %v489_v13, %v133_v15 }
  0xa1   :  { %v173_v18 = vrot.slane %v169_v16, 4  ;;  %v295_v19 = vrot.slane %v293_v17, 4 }
  0xa3   :  { %v174_v21 = vadd.f32 %v173_v18, %v169_v16  ;;  %v296_v22 = vadd.f32 %v295_v19, %v293_v17 }
  0xa5   :  { %v175_v24 = vrot.slane %v174_v21, 2  ;;  %v297_v25 = vrot.slane %v296_v22, 2 }
  0xa6   :  { %v118_v26 = vpop.f32.mrf.mxu0  ;;  %v135_v27 = vpop.f32.mrf.mxu1 }
  0xa7   :  { %v176_v28 = vadd.f32 %v175_v24, %v174_v21  ;;  %v298_v29 = vadd.f32 %v297_v25, %v296_v22  ;;  %v364_v26 = vpop.xlane.xlu0 %363 }
  0xa8   :  { %v365_v27 = vmax.f32 %v364_v26, 1e-24 }
  0xa9   :  { %v177_v31 = vrot.slane %v176_v28, 1  ;;  %v299_v32 = vrot.slane %v298_v29, 1 }
  0xaa   :  { %v377_v30 = vand.u32 2147483648, %v365_v27  ;;  %vm371_vm6 = vweird.f32 %v365_v27 }
  0xab   :  { %v178_v33 = vadd.f32 %v177_v31, %v176_v28  ;;  %v300_v34 = vadd.f32 %v299_v32, %v298_v29  ;;  %v375_v32 = vand.u32 2147483647, %v365_v27 }
  0xad   :  { %v179_v36 = vmul.f32 0.125, %v178_v33  ;;  %v301_v37 = vmul.f32 0.125, %v300_v34  ;;  %v378_v34 = vor.u32 1.1754944e-38, %v377_v30  ;;  %vm376_vm9 = vcmp.eq.f32.partialorder %v375_v32, 8.507059e+37 }
  0xaf   :  { %v610_v38 = vsub.f32 %v169_v16, %v179_v36  ;;  %v612_v39 = vsub.f32 %v293_v17, %v301_v37  ;;  %v490_v16 = vld [vmem:[%s654_s6] ss:$0 sm:$0xff] }
  0xb1   :  { %v182_v41 = vmul.f32 %v610_v38, %v610_v38  ;;  %v304_v42 = vmul.f32 %v612_v39, %v612_v39 }
  0xb3   :  { %v183_v43 = vrot.slane %v182_v41, 4  ;;  %v305_v44 = vrot.slane %v304_v42, 4 }
  0xb5   :  { %v184_v46 = vadd.f32 %v183_v43, %v182_v41  ;;  %v306_v47 = vadd.f32 %v305_v44, %v304_v42 }
  0xb7   :  { %v185_v48 = vrot.slane %v184_v46, 2  ;;  %v307_v49 = vrot.slane %v306_v47, 2 }
  0xb9   :  { %v186_v51 = vadd.f32 %v185_v48, %v184_v46  ;;  %v308_v52 = vadd.f32 %v307_v49, %v306_v47 }
  0xbb   :  { %v187_v53 = vrot.slane %v186_v51, 1  ;;  %v309_v54 = vrot.slane %v308_v52, 1 }
  0xbd   :  { %v188_v56 = vadd.f32 %v187_v53, %v186_v51  ;;  %v310_v57 = vadd.f32 %v309_v54, %v308_v52 }
  0xbf   :  { %v189_v58 = vmul.f32 0.125, %v188_v56  ;;  %v311_v59 = vmul.f32 0.125, %v310_v57 }
  0xc1   :  { %v190_v60 = vadd.f32 1e-05, %v189_v58  ;;  %v312_v61 = vadd.f32 1e-05, %v311_v59 }
  0xc3   :  { %492 = vrsqrt.f32 %v190_v60  ;;  %vm197_vm2 = vweird.f32 %v190_v60  ;;  %vm319_vm4 = vweird.f32 %v312_v61 }
  0xc4   :  { %494 = vrsqrt.f32 %v312_v61 }
  0xc5   :  { %496 = vrcp.f32 %v365_v27 }
  0xc9   :  { %v493_v62 = vpop.eup %492 }
  0xca   :  { %v495_v63 = vpop.eup %494  ;;  %v192_v0 = vmul.f32 %v493_v62, %v190_v60  ;;  %vm198_vm0 = vweird.f32 %v493_v62 }
  0xcb   :  { %v314_v1 = vmul.f32 %v495_v63, %v312_v61  ;;  %vm320_vm1 = vweird.f32 %v495_v63  ;;  %vm199_vm3 = vmor %vm197_vm2, %vm198_vm0  ;;  %v497_v28 = vpop.eup %496 }
  0xcc   :  { %v193_v2 = vmul.f32 %v493_v62, %v192_v0  ;;  %vm321_vm5 = vmor %vm319_vm4, %vm320_vm1  ;;  %v367_v29 = vmul.f32 %v497_v28, %v365_v27  ;;  %vm372_vm7 = vweird.f32 %v497_v28 }
  0xcd   :  { %v315_v3 = vmul.f32 %v495_v63, %v314_v1  ;;  %vm373_vm8 = vmor %vm371_vm6, %vm372_vm7 }
  0xce   :  { %v194_v4 = vmul.f32 0.5, %v193_v2  ;;  %v368_v31 = vsub.f32 1.0, %v367_v29 }
  0xcf   :  { %v316_v5 = vmul.f32 0.5, %v315_v3 }
  0xd0   :  { %v195_v6 = vsub.f32 1.5, %v194_v4  ;;  %v369_v33 = vmul.f32 %v497_v28, %v368_v31 }
  0xd1   :  { %v317_v7 = vsub.f32 1.5, %v316_v5 }
  0xd2   :  { %v196_v9 = vmul.f32 %v493_v62, %v195_v6  ;;  %v370_v35 = vadd.f32 %v497_v28, %v369_v33 }
  0xd3   :  { %v318_v10 = vmul.f32 %v495_v63, %v317_v7 }
  0xd4   :  { %v200_v11 = vsel %vm199_vm3, %v493_v62, %v196_v9  ;;  %v374_v36 = vsel %vm373_vm8, %v497_v28, %v370_v35 }
  0xd5   :  { %v201_v12 = vmul.f32 %v200_v11, %v146_v8  ;;  %v322_v13 = vsel %vm321_vm5, %v495_v63, %v318_v10  ;;  %v379_v37 = vsel %vm376_vm9, %v378_v34, %v374_v36 }
  0xd6   :  { %v323_v14 = vmul.f32 %v322_v13, %v146_v8 }
  0xd7   :  { %v202_v15 = vperm.slane %v201_v12, 0 }
  0xd8   :  { %v324_v17 = vperm.slane %v323_v14, 0 }
  0xd9   :  { %v203_v18 = vmul.f32 %v202_v15, %v610_v38  ;;  %v380_v38 = vmul.f32 %v379_v37, %v364_v26 }
  0xda   :  { %v325_v19 = vmul.f32 %v324_v17, %v612_v39 }
  0xdb   :  { %v207_v20 = vadd.f32 %v490_v16, %v203_v18  ;;  %v382_v39 = vsel %vm381_vm10, %v380_v38, 0.0 }
  0xdc   :  { %v326_v21 = vadd.f32 %v490_v16, %v325_v19  ;;  %383 = vadd.xlane.f32.xlu0 %v382_v39 }
  0xdd   :  { %v208_v22 = vmax.f32 %v207_v20, 0.0 }
  0xde   :  { %v327_v23 = vmax.f32 %v326_v21, 0.0 }
  0xdf   :  { %v209_v24 = vpack.c.bf16 %v208_v22, %v208_v22 }
  0xe0   :  { %v328_v25 = vpack.c.bf16 %v327_v23, %v327_v23 }
  0xe1   :  { %269 = vmatmul.bf16.vlgmr.msra.gmra.mxu2 %v209_v24 }
  0xe2   :  { %337 = vmatmul.bf16.vlgmr.msra.gmra.mxu3 %v328_v25 }
 0x14f   :  { %v384_v49 = vpop.xlane.xlu0 %383 }
 0x150   :  { %v385_v50 = vrot.slane %v384_v49, 4 }
 0x152   :  { %v386_v51 = vadd.f32 %v385_v50, %v384_v49 }
 0x154   :  { %v387_v52 = vrot.slane %v386_v51, 2 }
 0x156   :  { %v388_v53 = vadd.f32 %v387_v52, %v386_v51 }
 0x158   :  { %v389_v54 = vrot.slane %v388_v53, 1 }
 0x15a   :  { %v390_v55 = vadd.f32 %v389_v54, %v388_v53 }
 0x15c   :  { %487 = vpush %v390_v55 }
 0x164   :  { %v270_v41 = vpop.f32.mrf.mxu2 }
 0x165   :  { %v271_v42 = vadd.f32 %v491_v40, %v270_v41  ;;  %v338_v43 = vpop.f32.mrf.mxu3 }
 0x166   :  { %v339_v45 = vadd.f32 %v491_v40, %v338_v43 }
 0x167   :  { %v274_v44 = vmul.f32 %v271_v42, %v271_v42 }
 0x168   :  { %v342_v48 = vmul.f32 %v339_v45, %v339_v45 }
 0x169   :  { %275 = vadd.xlane.f32.xlu1 %v274_v44 }
 0x16c   :  { %v272_v46 = vpop.f32.mrf.mxu2 }
 0x16d   :  { %v340_v47 = vpop.f32.mrf.mxu3 }
 0x171   :  { %343 = vadd.xlane.f32.xlu1 %v342_v48 }
 0x18d   :  { %s488_s17 = spop %487 }
 0x18e   :  { %s392_s8 = smul.f32 0.005, %s488_s17 }
 0x190   :  { %v393_v56 = vstv %s392_s8 }
 0x191   :  { %394 = vst [vmem:[%s659_s11] sm:$0x1] %v393_v56 }
 0x1dc   :  { %v276_v57 = vpop.xlane.xlu1 %275 }
 0x1dd   :  { %v277_v58 = vmax.f32 %v276_v57, 1e-24 }
 0x1df   :  { %498 = vrsqrt.f32 %v277_v58  ;;  %vm284_vm12 = vweird.f32 %v277_v58 }
 0x1e4   :  { %v344_v59 = vpop.xlane.xlu1 %343 }
 0x1e5   :  { %v499_v60 = vpop.eup %498  ;;  %v345_v61 = vmax.f32 %v344_v59, 1e-24 }
 0x1e6   :  { %v279_v62 = vmul.f32 %v499_v60, %v277_v58  ;;  %vm285_vm11 = vweird.f32 %v499_v60 }
 0x1e7   :  { %500 = vrsqrt.f32 %v345_v61  ;;  %vm286_vm13 = vmor %vm284_vm12, %vm285_vm11  ;;  %vm352_vm15 = vweird.f32 %v345_v61 }
 0x1e8   :  { %v280_v63 = vmul.f32 %v499_v60, %v279_v62 }
 0x1ea   :  { %v281_v0 = vmul.f32 0.5, %v280_v63 }
 0x1ec   :  { %v282_v1 = vsub.f32 1.5, %v281_v0 }
 0x1ed   :  { %v501_v2 = vpop.eup %500 }
 0x1ee   :  { %v283_v3 = vmul.f32 %v499_v60, %v282_v1  ;;  %v347_v4 = vmul.f32 %v501_v2, %v345_v61  ;;  %vm353_vm14 = vweird.f32 %v501_v2 }
 0x1ef   :  { %vm354_vm0 = vmor %vm352_vm15, %vm353_vm14 }
 0x1f0   :  { %v287_v5 = vsel %vm286_vm13, %v499_v60, %v283_v3  ;;  %v348_v6 = vmul.f32 %v501_v2, %v347_v4 }
 0x1f1   :  { %v288_v7 = vmul.f32 1.4142135, %v287_v5 }
 0x1f2   :  { %v349_v8 = vmul.f32 0.5, %v348_v6 }
 0x1f3   :  { %v289_v9 = vmul.f32 %v288_v7, %v271_v42 }
 0x1f4   :  { %v350_v10 = vsub.f32 1.5, %v349_v8 }
 0x1f5   :  { %v290_v11 = vpack.c.bf16 %v289_v9, %v289_v9 }
 0x1f6   :  { %v351_v12 = vmul.f32 %v501_v2, %v350_v10 }
 0x1f7   :  { %291 = vst [vmem:[%s660_s9] sm:$0xf] %v290_v11 }
 0x1f8   :  { %v355_v13 = vsel %vm354_vm0, %v501_v2, %v351_v12 }
 0x1f9   :  { %v356_v14 = vmul.f32 1.4142135, %v355_v13 }
 0x1fb   :  { %v357_v15 = vmul.f32 %v356_v14, %v339_v45 }
 0x1fd   :  { %v358_v16 = vpack.c.bf16 %v357_v15, %v357_v15 }
 0x1ff   :  { %359 = vst [vmem:[%s661_s10] sm:$0xf] %v358_v16 }

</bundles_post_ra>
